<compile_context>
chip_gen: v7x
topology: tpu7x:2x2x1
jax: 0.10.0
libtpu: 0.0.40
codegen_flags: <defaults>
</compile_context>

<pallas_src>
import functools

import jax
import jax.numpy as jnp
from jax.experimental import pallas as pl
from jax.experimental.pallas import tpu as pltpu


def _round_up(n, m):
    return ((n + m - 1) // m) * m


def critic_kernel(x_ref, w1_ref, b1_ref, w2_ref, b2_ref, o_ref):
    # fc1 on the MXU: bf16 inputs, f32 accumulate.
    h = jnp.dot(x_ref[...], w1_ref[...], preferred_element_type=jnp.float32)
    # bias + ReLU in f32 on the VPU (no bf16 elementwise, keeps v5e happy).
    h = jnp.maximum(h + b1_ref[...], 0.0)
    # fc2: [TB, H] x [H, 1] is a waste of the MXU -> VPU mul + row reduce (XLU).
    out = jnp.sum(h * w2_ref[...], axis=-1, keepdims=True)
    o_ref[...] = (out + b2_ref[0, 0]).astype(o_ref.dtype)


@functools.partial(jax.jit, static_argnames=("block_b",))
def critic_forward(x, w1, b1, w2, b2, *, block_b=1024):
    """x: [B, state_size] f32; returns [B, 1] f32 (same math as the torch module)."""
    B, S = x.shape
    H = w1.shape[1]

    # Batch tile: multiple of 8 (sublane), capped by block_b. Pad B to a multiple.
    TB = min(block_b, _round_up(B, 8))
    TB = _round_up(TB, 8)
    B_pad = _round_up(B, TB)
    if B_pad != B:
        x = jnp.pad(x, ((0, B_pad - B), (0, 0)))
    grid = (B_pad // TB,)

    # bf16 at the MXU inputs only (f32 accumulate + f32 elementwise downstream).
    x_bf16 = x.astype(jnp.bfloat16)
    w1_bf16 = w1.astype(jnp.bfloat16)

    out = pl.pallas_call(
        critic_kernel,
        out_shape=jax.ShapeDtypeStruct((B_pad, 1), jnp.float32),
        grid=grid,
        in_specs=[
            pl.BlockSpec((TB, S), lambda i: (i, 0)),          # x tile (pipelined)
            pl.BlockSpec((S, H), lambda i: (0, 0)),           # w1, resident
            pl.BlockSpec((1, H), lambda i: (0, 0)),           # b1, resident
            pl.BlockSpec((1, H), lambda i: (0, 0)),           # w2 row, resident
            pl.BlockSpec(memory_space=pltpu.MemorySpace.SMEM),  # b2 scalar
        ],
        out_specs=pl.BlockSpec((TB, 1), lambda i: (i, 0)),
        # TODO(synk): for very large B, a lane-dense (B//128, 128) output layout
        # avoids masked vst.msk stores; irrelevant at demo sizes.
        compiler_params=pltpu.CompilerParams(
            dimension_semantics=("parallel",),
            vmem_limit_bytes=64 * 1024 * 1024,
        ),
    )(
        x_bf16,
        w1_bf16,
        b1.reshape(1, H).astype(jnp.float32),
        w2.reshape(1, H).astype(jnp.float32),
        b2.reshape(1, 1).astype(jnp.float32),
    )
    return out[:B]


def init_params(key, state_size, hidden_size):
    """nn.Linear-style U(-1/sqrt(fan_in), 1/sqrt(fan_in)) init."""
    k1, k2, k3, k4 = jax.random.split(key, 4)
    bound1 = 1.0 / jnp.sqrt(state_size)
    bound2 = 1.0 / jnp.sqrt(hidden_size)
    # w1 stored [in, out] (pre-transposed vs torch); w2 stored [1, hidden]
    # (identical to torch fc2.weight [out=1, in=hidden]).
    w1 = jax.random.uniform(k1, (state_size, hidden_size), jnp.float32, -bound1, bound1)
    b1 = jax.random.uniform(k2, (hidden_size,), jnp.float32, -bound1, bound1)
    w2 = jax.random.uniform(k3, (1, hidden_size), jnp.float32, -bound2, bound2)
    b2 = jax.random.uniform(k4, (1,), jnp.float32, -bound2, bound2)
    return w1, b1, w2, b2


def _reference(x, w1, b1, w2, b2):
    # Same math, same bf16-at-the-matmul precision as the kernel.
    h = jnp.dot(x.astype(jnp.bfloat16), w1.astype(jnp.bfloat16),
                preferred_element_type=jnp.float32)
    h = jnp.maximum(h + b1, 0.0)
    return jnp.sum(h * w2, axis=-1, keepdims=True) + b2


if __name__ == "__main__":
    state_size = 32
    hidden_size = 128

    key = jax.random.PRNGKey(0)
    kx, kp = jax.random.split(key)
    w1, b1, w2, b2 = init_params(kp, state_size, hidden_size)

    ok = True
    # Case 1: tile-aligned batch.  Case 2: odd batch exercising the pad path.
    for batch in (8, 13):
        kx, kb = jax.random.split(kx)
        x = jax.random.normal(kb, (batch, state_size), jnp.float32)

        out = critic_forward(x, w1, b1, w2, b2)
        jax.block_until_ready(out)

        ref = _reference(x, w1, b1, w2, b2)
        ok &= out.shape == (batch, 1)
        ok &= bool(jnp.allclose(out, ref, atol=1e-4, rtol=1e-4))

    assert ok
    print("KERNEL_OK")
</pallas_src>

<mosaic_0001>
module attributes {stable_mosaic.version = 11 : i64} {
  func.func @critic_kernel(%arg0: i32, %arg1: memref<8x32xbf16, #tpu.memory_space<vmem>>, %arg2: memref<32x128xbf16, #tpu.memory_space<vmem>>, %arg3: memref<1x128xf32, #tpu.memory_space<vmem>>, %arg4: memref<1x128xf32, #tpu.memory_space<vmem>>, %arg5: memref<1x1xf32, #tpu.memory_space<smem>>, %arg6: memref<8x1xf32, #tpu.memory_space<vmem>>) attributes {dimension_semantics = [#tpu.dimension_semantics<parallel>], iteration_bounds = array<i64: 1>, scalar_prefetch = 0 : i64, scratch_operands = 0 : i64, tpu.core_type = #tpu.core_type<tc>, window_params = [{transform_indices = @transform_0, window_bounds = array<i64: 8, 32>}, {pipeline_mode = #tpu.pipeline_mode<synchronous>, transform_indices = @transform_1, window_bounds = array<i64: 32, 128>}, {pipeline_mode = #tpu.pipeline_mode<synchronous>, transform_indices = @transform_2, window_bounds = array<i64: 1, 128>}, {pipeline_mode = #tpu.pipeline_mode<synchronous>, transform_indices = @transform_3, window_bounds = array<i64: 1, 128>}, {transform_indices = @transform_4, window_bounds = array<i64: 1, 1>}, {transform_indices = @transform_5, window_bounds = array<i64: 8, 1>}]} {
    %c0 = arith.constant 0 : index
    %c0_0 = arith.constant 0 : index
    %0 = vector.load %arg1[%c0, %c0_0] : memref<8x32xbf16, #tpu.memory_space<vmem>>, vector<8x32xbf16>
    %c0_1 = arith.constant 0 : index
    %c0_2 = arith.constant 0 : index
    %1 = vector.load %arg2[%c0_1, %c0_2] : memref<32x128xbf16, #tpu.memory_space<vmem>>, vector<32x128xbf16>
    %cst = arith.constant dense<0.000000e+00> : vector<8x128xf32>
    %2 = tpu.matmul %0, %1, %cst {dimension_numbers = #tpu.dot_dimension_numbers<[1], [0], [0], [1], [0, 0, 1, 1], [], []>} : vector<8x32xbf16>, vector<32x128xbf16>, vector<8x128xf32> -> vector<8x128xf32>
    %c0_3 = arith.constant 0 : index
    %c0_4 = arith.constant 0 : index
    %3 = vector.load %arg3[%c0_3, %c0_4] : memref<1x128xf32, #tpu.memory_space<vmem>>, vector<1x128xf32>
    %4 = vector.broadcast %3 : vector<1x128xf32> to vector<8x128xf32>
    %5 = arith.addf %2, %4 : vector<8x128xf32>
    %cst_5 = arith.constant 0.000000e+00 : f32
    %6 = vector.broadcast %cst_5 : f32 to vector<8x128xf32>
    %7 = arith.maximumf %5, %6 : vector<8x128xf32>
    %c0_6 = arith.constant 0 : index
    %c0_7 = arith.constant 0 : index
    %8 = vector.load %arg4[%c0_6, %c0_7] : memref<1x128xf32, #tpu.memory_space<vmem>>, vector<1x128xf32>
    %9 = vector.broadcast %8 : vector<1x128xf32> to vector<8x128xf32>
    %10 = arith.mulf %7, %9 : vector<8x128xf32>
    %cst_8 = arith.constant dense<0.000000e+00> : vector<8xf32>
    %11 = vector.multi_reduction <add>, %10, %cst_8 [1] : vector<8x128xf32> to vector<8xf32>
    %12 = vector.shape_cast %11 : vector<8xf32> to vector<8x1xf32>
    %c0_9 = arith.constant 0 : index
    %c0_10 = arith.constant 0 : index
    %13 = memref.load %arg5[%c0_9, %c0_10] : memref<1x1xf32, #tpu.memory_space<smem>>
    %14 = vector.broadcast %13 : f32 to vector<8x1xf32>
    %15 = arith.addf %12, %14 : vector<8x1xf32>
    %c0_11 = arith.constant 0 : index
    %c0_12 = arith.constant 0 : index
    %16 = vector.load %arg6[%c0_11, %c0_12] : memref<8x1xf32, #tpu.memory_space<vmem>>, vector<8x1xf32>
    tpu.vector_store %arg6[%c0_11, %c0_12], %15 {strides = array<i32>} : memref<8x1xf32, #tpu.memory_space<vmem>>, vector<8x1xf32>,
    return
  }
  func.func @transform_0(%arg0: i32) -> (i32, i32) {
    %c0_i32 = arith.constant 0 : i32
    %c0_i32_0 = arith.constant 0 : i32
    return %arg0, %c0_i32 : i32, i32
  }
  func.func @transform_1(%arg0: i32) -> (i32, i32) {
    %c0_i32 = arith.constant 0 : i32
    %c0_i32_0 = arith.constant 0 : i32
    %c0_i32_1 = arith.constant 0 : i32
    return %c0_i32, %c0_i32_0 : i32, i32
  }
  func.func @transform_2(%arg0: i32) -> (i32, i32) {
    %c0_i32 = arith.constant 0 : i32
    %c0_i32_0 = arith.constant 0 : i32
    %c0_i32_1 = arith.constant 0 : i32
    return %c0_i32, %c0_i32_0 : i32, i32
  }
  func.func @transform_3(%arg0: i32) -> (i32, i32) {
    %c0_i32 = arith.constant 0 : i32
    %c0_i32_0 = arith.constant 0 : i32
    %c0_i32_1 = arith.constant 0 : i32
    return %c0_i32, %c0_i32_0 : i32, i32
  }
  func.func @transform_4(%arg0: i32) -> (i32, i32) {
    %c0_i32 = arith.constant 0 : i32
    %c0_i32_0 = arith.constant 0 : i32
    %c0_i32_1 = arith.constant 0 : i32
    return %c0_i32, %c0_i32_0 : i32, i32
  }
  func.func @transform_5(%arg0: i32) -> (i32, i32) {
    %c0_i32 = arith.constant 0 : i32
    %c0_i32_0 = arith.constant 0 : i32
    return %arg0, %c0_i32 : i32, i32
  }
}

</mosaic_0001>

<bundles_post_ra>
// kernel: critic_forward.1
= control target key start
LH: loop header
LB: loop body
LE: loop exit
PB: predicated region body
PF: predicated region fallthrough
CT: control target
= control target key end

     0   :  { %11 = vsyncpa [#allocation4], 0  ;;  %s420_s0 = inlined_call_operand.hbm [shape: bf16[8,32], index: 0, kind: input, shape index: {}]   ;;  %s421_s1 = inlined_call_operand.hbm [shape: bf16[32,128], index: 1, kind: input, shape index: {}]   ;;  %s422_s2 = inlined_call_operand.hbm [shape: f32[1,128], index: 2, kind: input, shape index: {}]   ;;  %s423_s3 = inlined_call_operand.hbm [shape: f32[1,128], index: 3, kind: input, shape index: {}]   ;;  %s424_s4 = inlined_call_operand.<no memory space> [shape: f32[1,1], index: 4, kind: input, shape index: {}]   ;;  %s425_s5 = inlined_call_operand.hbm [shape: f32[8,1], index: 5, kind: output, shape index: {}]  }
   0x1   :  { %12 = vsyncpa [#allocation7], 0 }
   0x2   :  { %13 = vsyncpa [#allocation10], 0 }
   0x3   :  { %14 = vsyncpa [#allocation5], 0  ;;  %s318_s18 = smov [#allocation6]   ;;  %s200_s22 = scalar_lea.hbm %s421_s1, 256 }
   0x4   :  { %s30_s19 = sshll.u32 %s318_s18, 4  ;;  %p201_p0 = scmp.ne.s32.totalorder %s421_s1, %s200_s22  ;;  %s31_s19 = int_to_ptr.vmem [resolvable:$true] %s30_s19 }
   0x5   :  { %p204_p1 = scmp.lt.u32.totalorder %s200_s22, %s421_s1 }
   0x7   :  { %p206_p2 = pnand %p204_p1, %p201_p0 }
   0x9   :  { %209 = shalt.err (!%p206_p2)
}
   0xa   :  { %s210_s27 = scalar_lea.vmem %s31_s19, 256  ;;  %p215_p4 = scmp.lt.s32.totalorder %s31_s19, %s31_s19 }
   0xb   :  { %p211_p3 = scmp.ne.s32.totalorder %s31_s19, %s210_s27  ;;  %p216_p5 = scmp.lt.s32.totalorder %s210_s27, %s210_s27 }
   0xd   :  { %p217_p6 = por %p216_p5, %p215_p4 }
   0xf   :  { %p218_p7 = pnand %p217_p6, %p211_p3 }
  0x11   :  { %221 = shalt.err (!%p218_p7)
}
  0x12   :  { %s319_s28 = smov 64   ;;  %s320_s29 = smov 4  }
  0x13   :  { %36 = dma.hbm_to_vmem [thread:$0]  %s421_s1, 256, %s31_s19, [#allocation7], %s319_s28, %s319_s28, %s320_s29  }
  0x14   :  { %s321_s7 = smov [#allocation3]   ;;  %s322_s9 = smov [#allocation8]  }
  0x15   :  { %s21_s8 = sshll.u32 %s321_s7, 4  ;;  %s43_s10 = sshll.u32 %s322_s9, 4  ;;  %s22_s8 = int_to_ptr.vmem [resolvable:$true] %s21_s8  ;;  %s44_s10 = int_to_ptr.vmem [resolvable:$true] %s43_s10 }
  0x16   :  { %s222_s13 = scalar_lea.hbm %s420_s0, 64 }
  0x17   :  { %p223_p8 = scmp.ne.s32.totalorder %s420_s0, %s222_s13  ;;  %p226_p9 = scmp.lt.u32.totalorder %s222_s13, %s420_s0 }
  0x19   :  { %p228_p10 = pnand %p226_p9, %p223_p8 }
  0x1b   :  { %231 = shalt.err (!%p228_p10)
}
  0x1c   :  { %s232_s1 = scalar_lea.vmem %s22_s8, 64  ;;  %p237_p12 = scmp.lt.s32.totalorder %s22_s8, %s22_s8 }
  0x1d   :  { %p233_p11 = scmp.ne.s32.totalorder %s22_s8, %s232_s1  ;;  %p238_p13 = scmp.lt.s32.totalorder %s232_s1, %s232_s1 }
  0x1f   :  { %p239_p0 = por %p238_p13, %p237_p12 }
  0x21   :  { %p240_p1 = pnand %p239_p0, %p233_p11 }
  0x23   :  { %243 = shalt.err (!%p240_p1)
}
  0x24   :  { %24 = dma.hbm_to_vmem [thread:$0]  %s420_s0, 64, %s22_s8, [#allocation4]  }
  0x25   :  { %s244_s22 = scalar_lea.hbm %s422_s2, 16 }
  0x26   :  { %p245_p2 = scmp.ne.s32.totalorder %s422_s2, %s244_s22  ;;  %p248_p3 = scmp.lt.u32.totalorder %s244_s22, %s422_s2 }
  0x28   :  { %p250_p4 = pnand %p248_p3, %p245_p2 }
  0x2a   :  { %253 = shalt.err (!%p250_p4)
}
  0x2b   :  { %s254_s27 = scalar_lea.vmem %s44_s10, 16  ;;  %s258_s28 = scalar_lea.vmem %s44_s10, 32 }
  0x2c   :  { %p255_p5 = scmp.ne.s32.totalorder %s44_s10, %s254_s27  ;;  %p259_p6 = scmp.lt.s32.totalorder %s44_s10, %s44_s10 }
  0x2d   :  { %p260_p7 = scmp.lt.s32.totalorder %s258_s28, %s254_s27 }
  0x2f   :  { %p261_p8 = por %p260_p7, %p259_p6 }
  0x31   :  { %p262_p9 = pnand %p261_p8, %p255_p5 }
  0x33   :  { %265 = shalt.err (!%p262_p9)
}
  0x34   :  { %46 = dma.hbm_to_vmem [thread:$0]  %s422_s2, 16, %s44_s10, [#allocation7]  }
  0x35   :  { %s323_s30 = smov [#allocation9]   ;;  %s266_s9 = scalar_lea.hbm %s423_s3, 16 }
  0x36   :  { %s53_s6 = sshll.u32 %s323_s30, 4  ;;  %p267_p10 = scmp.ne.s32.totalorder %s423_s3, %s266_s9  ;;  %s54_s6 = int_to_ptr.vmem [resolvable:$true] %s53_s6 }
  0x37   :  { %p270_p11 = scmp.lt.u32.totalorder %s266_s9, %s423_s3 }
  0x39   :  { %p272_p12 = pnand %p270_p11, %p267_p10 }
  0x3b   :  { %275 = shalt.err (!%p272_p12)
}
  0x3c   :  { %s276_s15 = scalar_lea.vmem %s54_s6, 16  ;;  %s280_s2 = scalar_lea.vmem %s54_s6, 32 }
  0x3d   :  { %p277_p13 = scmp.ne.s32.totalorder %s54_s6, %s276_s15  ;;  %p281_p0 = scmp.lt.s32.totalorder %s54_s6, %s54_s6 }
  0x3e   :  { %p282_p1 = scmp.lt.s32.totalorder %s280_s2, %s276_s15 }
  0x40   :  { %p283_p2 = por %p282_p1, %p281_p0 }
  0x42   :  { %p284_p3 = pnand %p283_p2, %p277_p13 }
  0x44   :  { %287 = shalt.err (!%p284_p3)
}
  0x45   :  { %56 = dma.hbm_to_vmem [thread:$0]  %s423_s3, 16, %s54_s6, [#allocation10]  }
  0x46   :  { %310 = dma.done.wait [#allocation4], 64  }
  0x47   :  { %311 = vsyncadd [#allocation4], 4294967232 }
  0x48   :  { %312 = dma.done.wait [#allocation7], 272  }
  0x49   :  { %313 = vsyncadd [#allocation7], 4294967024 }
  0x4a   :  { %314 = dma.done.wait [#allocation10], 16  }
  0x4b   :  { %315 = vsyncadd [#allocation10], 4294967280  ;;  %v324_v0 = vmov 0.0   ;;  %vm325_vm0 = vmmov 0   ;;  %v198_v1 = vld [vmem:[#allocation6] sm:$0xff]   ;;  %v199_v2 = vld [vmem:[#allocation6 + $0x8] sm:$0xff]   ;;  %v152_v13 = vstv %s424_s4 }
  0x4c   :  { %181 = vmatprep.subr.bf16.mxu0 %v324_v0  ;;  %185 = vmatprep.mubr.msk.bf16.mxu0 %vm325_vm0, %v324_v0  ;;  %v72_v3 = vld [vmem:[#allocation3] sm:$0xf]  ;;  %vm96_vm1 = vcmask 261120   ;;  %v173_v4 = vld [vmem:[#allocation8] ss:$0 sm:$0xff]  ;;  %s326_s1 = smov [#allocation11]  }
  0x4d   :  { %182 = vmatpush3.bf16.msra.mxu0 %v198_v1  ;;  %v177_v9 = vld [vmem:[#allocation9] ss:$0 sm:$0xff]  ;;  %s162_s18 = sshll.u32 %s326_s1, 4  ;;  %vm154_vm2 = vcmask 7168   ;;  %s163_s18 = int_to_ptr.vmem [resolvable:$true] %s162_s18 }
  0x4e   :  { %183 = vmatprep.subr.bf16.mxu0 %v324_v0  ;;  %s288_s19 = scalar_lea.vmem %s163_s18, 128  ;;  %p293_p5 = scmp.lt.s32.totalorder %s163_s18, %s163_s18 }
  0x4f   :  { %p289_p4 = scmp.ne.s32.totalorder %s163_s18, %s288_s19  ;;  %p294_p6 = scmp.lt.s32.totalorder %s288_s19, %s288_s19 }
  0x51   :  { %184 = vmatpush3.bf16.msra.mxu0 %v199_v2  ;;  %p295_p7 = por %p294_p6, %p293_p5 }
  0x53   :  { %p296_p8 = pnand %p295_p7, %p289_p4 }
  0x54   :  { %186 = vmatmul.mubr.msk.bf16.vlgmr.msra.gmra.mrb[0].mxu0 %vm96_vm1, %v72_v3 }
 0x127   :  { %v134_v5 = vpop.f32.mrb[0].mxu0 }
 0x128   :  { %v135_v6 = vadd.f32 %v173_v4, %v134_v5  ;;  %v187_v7 = vpop.f32.mrb[1].mxu0 }
 0x129   :  { %v137_v8 = vpop.f32.mrb[2].mxu0 }
 0x12a   :  { %v140_v10 = vmax.f32 %v135_v6, 0.0  ;;  %v188_v11 = vpop.f32.mrb[3].mxu0 }
 0x12c   :  { %v148_v12 = vmul.f32 %v177_v9, %v140_v10 }
 0x12e   :  { %149 = vadd.xlane.f32.xlu0 %v148_v12 }
 0x1bb   :  { %v150_v14 = vpop.xlane.xlu0 %149 }
 0x1bc   :  { %v153_v15 = vadd.f32 %v152_v13, %v150_v14 }
 0x1be   :  { %155 = vst.msk [vmem:[#allocation11] sm:$0xff] %vm154_vm2, %v153_v15 }
 0x1bf   :  { %299 = shalt.err (!%p296_p8)
}
 0x1c0   :  { %s300_s22 = scalar_lea.hbm %s425_s5, 128 }
 0x1c1   :  { %p301_p9 = scmp.ne.s32.totalorder %s425_s5, %s300_s22  ;;  %p304_p10 = scmp.lt.u32.totalorder %s300_s22, %s425_s5 }
 0x1c3   :  { %p306_p11 = pnand %p304_p10, %p301_p9 }
 0x1c5   :  { %309 = shalt.err (!%p306_p11)
}
 0x1c6   :  { %165 = dma.vmem_to_hbm [thread:$0]  %s163_s18, 128, %s425_s5, [#allocation5]  }
 0x1c7   :  { %316 = dma.done.wait [#allocation5], 128  }
 0x1c8   :  { %317 = vsyncadd [#allocation5], 4294967168 }
 0x1c9   :  { %169 = vsyncpa [#allocation4], 1 }
 0x1ca   :  { %170 = vsyncpa [#allocation7], 1 }
 0x1cb   :  { %171 = vsyncpa [#allocation10], 1 }
 0x1cc   :  { %172 = vsyncpa [#allocation5], 1 }

</bundles_post_ra>
